<compile_context>
chip_gen: v7x
topology: tpu7x:2x2x1
jax: 0.10.0
libtpu: 0.0.40
codegen_flags: <defaults>
</compile_context>

<pallas_src>
import functools

import jax
import jax.numpy as jnp
from jax import lax
from jax.experimental import pallas as pl
from jax.experimental.pallas import tpu as pltpu


# ----------------------------------- kernel ----------------------------------
def _additive_event_kernel(ids_ref, hi_ref, lo_ref, out_ref):
    """One (row-block, K-block) grid step.

    ids_ref: (block_rows, 2) int32, col0 = token id, col1 = bin id + vocab offset
    hi_ref / lo_ref: (block_k, E_pad) bf16 hi/lo halves of the combined table
    out_ref: (block_rows, E_pad) f32 — accumulated across the K grid axis.
    """
    k = pl.program_id(1)
    block_rows = ids_ref.shape[0]
    block_k = hi_ref.shape[0]
    base = k * block_k

    # Shift the (block_rows, 1) ids into this K-block's local coordinates
    # (cheaper than adding `base` to the full (block_rows, block_k) iota).
    tok = ids_ref[:, 0:1] - base
    binx = ids_ref[:, 1:2] - base

    lane = lax.broadcasted_iota(jnp.int32, (block_rows, block_k), 1)
    # Two-hot selector: token rows [0, V) and offset bin rows [V, V+NB) are
    # disjoint, so OR == sum.  0.0 / 1.0 are exact in bf16.
    sel = ((lane == tok) | (lane == binx)).astype(jnp.bfloat16)

    # Two single-pass bf16 MXU matmuls, accumulated in f32.
    acc = jnp.dot(sel, hi_ref[...], preferred_element_type=jnp.float32)
    acc = acc + jnp.dot(sel, lo_ref[...], preferred_element_type=jnp.float32)

    @pl.when(k == 0)
    def _():
        out_ref[...] = acc

    @pl.when(k > 0)
    def _():
        out_ref[...] += acc


# ---------------------------------- wrapper -----------------------------------
def _ceil_to(a, b):
    return -(-a // b) * b


def _pad_dim(n):
    # Lane-dense: 128-aligned; bump to 256 alignment only once we already
    # exceed 128 (v6e/v7x MXU tiles are 256 deep/wide; v5e's 128x128 MXU is
    # already matched by 128 alignment and tiny dims are not inflated).
    return 128 if n <= 128 else _ceil_to(n, 256)


def _pick_block_rows(total_rows):
    # Largest row block in {512, 256, 128} that still leaves >= 2 grid steps,
    # so dimension_semantics=("parallel", ...) can split across TensorCores.
    for br in (512, 256, 128):
        if -(-total_rows // br) >= 2:
            return br
    return 128


def make_additive_event_encoder(enc_table, bins_table, include_time=False, *,
                                block_rows=None):
    """Build the encoder once (per weight update) and return a jitted forward.

    enc_table:  (vocab, E) f32 embedding table (row 0 = padding_idx row).
    bins_table: (n_bins + 1, E) f32 bins embedding table.
    Returned forward(input_ids) expects input_ids of shape (N, S, 2)."""
    V, E = enc_table.shape
    NB = bins_table.shape[0]

    E_pad = _pad_dim(E)
    V_pad = _pad_dim(V + NB)
    block_k = min(V_pad, 512)                 # K-tile of the combined vocab
    if V_pad % block_k:
        V_pad = _ceil_to(V_pad, block_k)
    num_k = V_pad // block_k

    # Combined table, built ONCE: rows [0, V) = encoder, [V, V+NB) = bins, rest 0.
    table = jnp.zeros((V_pad, E_pad), jnp.float32)
    table = table.at[:V, :E].set(enc_table.astype(jnp.float32))
    table = table.at[V:V + NB, :E].set(bins_table.astype(jnp.float32))
    # f32 -> bf16 hi/lo split (hi + lo reproduces the f32 value to ~2^-16 rel.).
    table_hi = table.astype(jnp.bfloat16)
    table_lo = (table - table_hi.astype(jnp.float32)).astype(jnp.bfloat16)

    @jax.jit
    def forward(input_ids):
        if input_ids.shape[-1] == 100:
            # TODO(synk): the `input.shape[-1] == 100` branch (embedding of the
            # whole last dim) is not translated; only the [token, bin] path is.
            raise NotImplementedError("shape[-1]==100 branch not implemented")

        N, S = input_ids.shape[:2]
        T = N * S
        br = block_rows if block_rows is not None else _pick_block_rows(T)
        T_pad = _ceil_to(T, br)

        ids = input_ids[..., :2].astype(jnp.int32).reshape(T, 2)
        ids = ids + jnp.array([0, V], jnp.int32)     # offset bin ids into table
        ids = jnp.pad(ids, ((0, T_pad - T), (0, 0))) # pad rows sliced off below

        # VMEM budget from actual buffers (double-buffered blocks + intermediates),
        # with 2x headroom; floored at the default 32 MiB, capped at v7x's 64 MiB.
        ids_b = br * 128 * 4                      # (br, 2) i32 block, lane-padded
        tab_b = block_k * E_pad * 2               # one bf16 table block
        out_b = br * E_pad * 4                    # f32 output block
        mid_b = br * block_k * 2 + br * E_pad * 4  # selector + f32 accumulator
        need = 2 * ids_b + 2 * 2 * tab_b + 2 * out_b + mid_b
        vmem_limit = int(min(64 * 2**20, max(32 * 2**20, 2 * need)))

        out = pl.pallas_call(
            _additive_event_kernel,
            out_shape=jax.ShapeDtypeStruct((T_pad, E_pad), jnp.float32),
            grid_spec=pltpu.PrefetchScalarGridSpec(
                num_scalar_prefetch=0,
                grid=(T_pad // br, num_k),
                in_specs=[
                    pl.BlockSpec((br, 2), lambda i, k: (i, 0)),
                    pl.BlockSpec((block_k, E_pad), lambda i, k: (k, 0)),
                    pl.BlockSpec((block_k, E_pad), lambda i, k: (k, 0)),
                ],
                out_specs=pl.BlockSpec((br, E_pad), lambda i, k: (i, 0)),
            ),
            compiler_params=pltpu.CompilerParams(
                dimension_semantics=("parallel", "arbitrary"),
                vmem_limit_bytes=vmem_limit,
            ),
        )(ids, table_hi, table_lo)

        emb = out[:T, :E].reshape(N, S, E)

        if include_time:
            # torch.arange(len(input)) indexes the *batch* dim; trivial per-batch
            # constants, computed in XLA (fused under jit).
            # TODO(synk): when E_pad >= E + 2 these could be written into the
            # padded output columns in-kernel to avoid the concat; skipped here
            # since the demo has E % 128 == 0 (no pad room without bumping E_pad).
            t = jnp.broadcast_to(
                jnp.arange(N, dtype=jnp.float32)[:, None, None], (N, S, 1))
            emb = jnp.concatenate(
                [emb, jnp.log(t + 1.0), jnp.exp(t / 1000.0) - 1.0], axis=-1)
        return emb

    return forward


# ----------------------------- pure-JAX reference -----------------------------
def reference(input_ids, enc_table, bins_table, include_time):
    tok = input_ids[..., 0]
    binx = input_ids[..., 1]
    emb = enc_table[tok] + bins_table[binx]
    if include_time:
        N, S = tok.shape
        t = jnp.broadcast_to(
            jnp.arange(N, dtype=jnp.float32)[:, None, None], (N, S, 1))
        emb = jnp.concatenate(
            [emb, jnp.log(t + 1.0), jnp.exp(t / 1000.0) - 1.0], axis=-1)
    return emb


if __name__ == "__main__":
    # Small shapes: batch=4, seq=64, vocab=64, emb_dim=128, n_bins=8, include_time
    N, S = 4, 64
    vocab, emb_dim, n_bins = 64, 128, 8
    include_time = True

    key = jax.random.PRNGKey(0)
    k_enc, k_bin, k_tok, k_bix = jax.random.split(key, 4)
    enc_table = jax.random.normal(k_enc, (vocab, emb_dim), jnp.float32)
    enc_table = enc_table.at[0].set(0.0)                 # padding_idx=0 -> zero row
    bins_table = jax.random.normal(k_bin, (n_bins + 1, emb_dim), jnp.float32)

    tok_ids = jax.random.randint(k_tok, (N, S), 0, vocab, jnp.int32)
    bin_ids = jax.random.randint(k_bix, (N, S), 0, n_bins + 1, jnp.int32)
    inp = jnp.stack([tok_ids, bin_ids], axis=-1)         # (N, S, 2)

    encoder = make_additive_event_encoder(enc_table, bins_table, include_time)
    out = jax.block_until_ready(encoder(inp))

    ref = reference(inp, enc_table, bins_table, include_time)
    assert out.shape == (N, S, emb_dim + 2), out.shape
    # bf16 hi/lo split leaves a residual of <= ~2^-16 relative per gathered row
    # (two rows summed), i.e. a few 1e-5 absolute for O(1) embeddings.
    err = float(jnp.max(jnp.abs(out - ref)))
    assert err < 5e-4, err

    print("KERNEL_OK")
</pallas_src>

<mosaic_0001>
module attributes {stable_mosaic.version = 11 : i64} {
  func.func @_additive_event_kernel(%arg0: i32, %arg1: i32, %arg2: memref<128x2xi32, #tpu.memory_space<vmem>>, %arg3: memref<128x128xbf16, #tpu.memory_space<vmem>>, %arg4: memref<128x128xbf16, #tpu.memory_space<vmem>>, %arg5: memref<128x128xf32, #tpu.memory_space<vmem>>) attributes {dimension_semantics = [#tpu.dimension_semantics<parallel>, #tpu.dimension_semantics<arbitrary>], iteration_bounds = array<i64: 2, 1>, scalar_prefetch = 0 : i64, scratch_operands = 0 : i64, tpu.core_type = #tpu.core_type<tc>, window_params = [{transform_indices = @transform_0, window_bounds = array<i64: 128, 2>}, {transform_indices = @transform_1, window_bounds = array<i64: 128, 128>}, {transform_indices = @transform_2, window_bounds = array<i64: 128, 128>}, {transform_indices = @transform_3, window_bounds = array<i64: 128, 128>}]} {
    %c128_i32 = arith.constant 128 : i32
    %0 = arith.muli %arg1, %c128_i32 : i32
    %c0 = arith.constant 0 : index
    %c0_0 = arith.constant 0 : index
    %1 = vector.load %arg2[%c0, %c0_0] : memref<128x2xi32, #tpu.memory_space<vmem>>, vector<128x1xi32>
    %2 = vector.broadcast %0 : i32 to vector<128x1xi32>
    %3 = arith.subi %1, %2 : vector<128x1xi32>
    %c0_1 = arith.constant 0 : index
    %c1 = arith.constant 1 : index
    %4 = vector.load %arg2[%c0_1, %c1] : memref<128x2xi32, #tpu.memory_space<vmem>>, vector<128x1xi32>
    %5 = vector.broadcast %0 : i32 to vector<128x1xi32>
    %6 = arith.subi %4, %5 : vector<128x1xi32>
    %7 = tpu.iota {dimensions = array<i32: 1>} : vector<128x128xi32>
    %8 = vector.broadcast %3 : vector<128x1xi32> to vector<128x128xi32>
    %9 = arith.cmpi eq, %7, %8 : vector<128x128xi32>
    %10 = vector.broadcast %6 : vector<128x1xi32> to vector<128x128xi32>
    %11 = arith.cmpi eq, %7, %10 : vector<128x128xi32>
    %12 = arith.ori %9, %11 : vector<128x128xi1>
    %13 = arith.extui %12 : vector<128x128xi1> to vector<128x128xi32>
    %14 = arith.sitofp %13 : vector<128x128xi32> to vector<128x128xf32>
    %15 = arith.truncf %14 : vector<128x128xf32> to vector<128x128xbf16>
    %c0_2 = arith.constant 0 : index
    %c0_3 = arith.constant 0 : index
    %16 = vector.load %arg3[%c0_2, %c0_3] : memref<128x128xbf16, #tpu.memory_space<vmem>>, vector<128x128xbf16>
    %cst = arith.constant dense<0.000000e+00> : vector<128x128xf32>
    %17 = tpu.matmul %15, %16, %cst {dimension_numbers = #tpu.dot_dimension_numbers<[1], [0], [0], [1], [0, 0, 1, 1], [], []>} : vector<128x128xbf16>, vector<128x128xbf16>, vector<128x128xf32> -> vector<128x128xf32>
    %c0_4 = arith.constant 0 : index
    %c0_5 = arith.constant 0 : index
    %18 = vector.load %arg4[%c0_4, %c0_5] : memref<128x128xbf16, #tpu.memory_space<vmem>>, vector<128x128xbf16>
    %cst_6 = arith.constant dense<0.000000e+00> : vector<128x128xf32>
    %19 = tpu.matmul %15, %18, %cst_6 {dimension_numbers = #tpu.dot_dimension_numbers<[1], [0], [0], [1], [0, 0, 1, 1], [], []>} : vector<128x128xbf16>, vector<128x128xbf16>, vector<128x128xf32> -> vector<128x128xf32>
    %20 = arith.addf %17, %19 : vector<128x128xf32>
    %c0_i32 = arith.constant 0 : i32
    %21 = arith.cmpi eq, %arg1, %c0_i32 : i32
    %22 = arith.extui %21 : i1 to i32
    %c0_i32_7 = arith.constant 0 : i32
    %23 = arith.cmpi ne, %22, %c0_i32_7 : i32
    scf.if %23 {
      %c0_10 = arith.constant 0 : index
      %c0_11 = arith.constant 0 : index
      %27 = vector.load %arg5[%c0_10, %c0_11] : memref<128x128xf32, #tpu.memory_space<vmem>>, vector<128x128xf32>
      tpu.vector_store %arg5[%c0_10, %c0_11], %20 {strides = array<i32>} : memref<128x128xf32, #tpu.memory_space<vmem>>, vector<128x128xf32>,
    } else {
    }
    %c0_i32_8 = arith.constant 0 : i32
    %24 = arith.cmpi sgt, %arg1, %c0_i32_8 : i32
    %25 = arith.extui %24 : i1 to i32
    %c0_i32_9 = arith.constant 0 : i32
    %26 = arith.cmpi ne, %25, %c0_i32_9 : i32
    scf.if %26 {
      %c0_10 = arith.constant 0 : index
      %c0_11 = arith.constant 0 : index
      %27 = vector.load %arg5[%c0_10, %c0_11] : memref<128x128xf32, #tpu.memory_space<vmem>>, vector<128x128xf32>
      %28 = arith.addf %27, %20 : vector<128x128xf32>
      %c0_12 = arith.constant 0 : index
      %c0_13 = arith.constant 0 : index
      %29 = vector.load %arg5[%c0_12, %c0_13] : memref<128x128xf32, #tpu.memory_space<vmem>>, vector<128x128xf32>
      tpu.vector_store %arg5[%c0_12, %c0_13], %28 {strides = array<i32>} : memref<128x128xf32, #tpu.memory_space<vmem>>, vector<128x128xf32>,
    } else {
    }
    return
  }
  func.func @transform_0(%arg0: i32, %arg1: i32) -> (i32, i32) {
    %c0_i32 = arith.constant 0 : i32
    %c0_i32_0 = arith.constant 0 : i32
    return %arg0, %c0_i32 : i32, i32
  }
  func.func @transform_1(%arg0: i32, %arg1: i32) -> (i32, i32) {
    %c0_i32 = arith.constant 0 : i32
    %c0_i32_0 = arith.constant 0 : i32
    return %arg1, %c0_i32 : i32, i32
  }
  func.func @transform_2(%arg0: i32, %arg1: i32) -> (i32, i32) {
    %c0_i32 = arith.constant 0 : i32
    %c0_i32_0 = arith.constant 0 : i32
    return %arg1, %c0_i32 : i32, i32
  }
  func.func @transform_3(%arg0: i32, %arg1: i32) -> (i32, i32) {
    %c0_i32 = arith.constant 0 : i32
    %c0_i32_0 = arith.constant 0 : i32
    return %arg0, %c0_i32 : i32, i32
  }
}

</mosaic_0001>

<bundles_post_ra>
// kernel: forward.1
= control target key start
LH: loop header
LB: loop body
LE: loop exit
PB: predicated region body
PF: predicated region fallthrough
CT: control target
= control target key end

     0   :  { %s1237_s12 = smov 0   ;;  %s1239_s13 = smov 0   ;;  %s1432_s0 = inlined_call_operand.vmem [shape: s32[256,2], index: 0, kind: input, shape index: {}]   ;;  %s1433_s1 = inlined_call_operand.vmem [shape: bf16[128,128], index: 1, kind: input, shape index: {}]   ;;  %s1434_s2 = inlined_call_operand.vmem [shape: bf16[128,128], index: 2, kind: input, shape index: {}]   ;;  %s1435_s3 = inlined_call_operand.vmem [shape: f32[256,128], index: 3, kind: output, shape index: {}]  }
   0x1   :  { %s1241_s14 = smov 0  }
   0x2 LB: > { %s25_s15 = sadd.s32 1, %s1208_s13  ;;  %p946_p0 = scmp.ge.s32.totalorder %s1212_s14, 1  ;;  %s1212_s14 = sphi %s1241_s14, %s13_s14   ;;  %s1208_s13 = sphi %s1239_s13, %s1437_s13   ;;  %s1204_s12 = sphi %s1237_s12, %s1436_s12  }
   0x3   : > { %p27_p1 = scmp.ge.s32.totalorder %s25_s15, 2  ;;  %p172_p2 = scmp.lt.s32.totalorder %s1212_s14, 3 }
   0x5   : > { %s1439_s15 = smov (%p27_p1, %s25_s15), 0  ;;  %p173_p3 = pnand %p946_p0, %p172_p2 }
   0x6   : > { %s947_s16 = sshll.u32 (!%p173_p3), %s1204_s12, 4  ;;  %v1174_v0 = vld [vmem:[%s1434_s2] sm:$0xff] (!%p173_p3)   ;;  %v1214_v1 = vmov (!%p173_p3), 1   ;;  %v1176_v3 = vld [vmem:[%s1434_s2 + $0x8] sm:$0xff] (!%p173_p3)   ;;  %v1178_v5 = vld [vmem:[%s1434_s2 + $0x10] sm:$0xff] (!%p173_p3)   ;;  %v1215_v17 = vmov (!%p173_p3), 0   ;;  %v265_v39 = vlaneseq (!%p173_p3) }
   0x7   : > { %176 = sbr.rel (%p173_p3) target bundleno = 453 (0x1c5), region = 32  ;;  %1158 = vset.pattern.permute.xlu0 (!%p173_p3), %v1214_v1  ;;  %1156 = vset.pattern.permute.xlu1 (!%p173_p3), %v1214_v1  ;;  %p207_p4 = scmp.lt.s32.totalorder (!%p173_p3), %s947_s16, 31  ;;  %v1175_v2 = vld [vmem:[%s1433_s1] sm:$0xff] (!%p173_p3)   ;;  %v1177_v4 = vld [vmem:[%s1433_s1 + $0x8] sm:$0xff] (!%p173_p3)   ;;  %v1179_v6 = vld [vmem:[%s1433_s1 + $0x10] sm:$0xff] (!%p173_p3)  }
   0x8   : > { %1049 = vmatprep.subr.bf16.mxu1 (!%p173_p3), %v1174_v0  ;;  %1081 = vmatprep.subr.bf16.mxu0 (!%p173_p3), %v1175_v2  ;;  %v1180_v13 = vld [vmem:[%s1434_s2 + $0x18] sm:$0xff] (!%p173_p3)   ;;  %v1182_v15 = vld [vmem:[%s1434_s2 + $0x20] sm:$0xff] (!%p173_p3)   ;;  %v1184_v18 = vld [vmem:[%s1434_s2 + $0x28] sm:$0xff] (!%p173_p3)   ;;  %v1349_v41 = vand.u32 (!%p173_p3), 127, %v265_v39  ;;  %v1216_v47 = vmov (!%p173_p3), 1.0|1.0  }
   0x9   : > { %1050 = vmatpush3.bf16.msra.mxu1 (!%p173_p3), %v1174_v0  ;;  %1082 = vmatpush3.bf16.msra.mxu0 (!%p173_p3), %v1175_v2  ;;  %v1181_v14 = vld [vmem:[%s1433_s1 + $0x18] sm:$0xff] (!%p173_p3)   ;;  %v1183_v16 = vld [vmem:[%s1433_s1 + $0x20] sm:$0xff] (!%p173_p3)   ;;  %v1185_v19 = vld [vmem:[%s1433_s1 + $0x28] sm:$0xff] (!%p173_p3)  }
   0xa   : > { %1051 = vmatprep.subr.bf16.mxu1 (!%p173_p3), %v1176_v3  ;;  %1083 = vmatprep.subr.bf16.mxu0 (!%p173_p3), %v1177_v4  ;;  %v1186_v20 = vld [vmem:[%s1434_s2 + $0x30] sm:$0xff] (!%p173_p3)   ;;  %v1188_v23 = vld [vmem:[%s1434_s2 + $0x38] sm:$0xff] (!%p173_p3)  }
   0xb   : > { %v1187_v21 = vld [vmem:[%s1433_s1 + $0x30] sm:$0xff] (!%p173_p3)   ;;  %v1189_v24 = vld [vmem:[%s1433_s1 + $0x38] sm:$0xff] (!%p173_p3)  }
   0xd   : > { %1052 = vmatpush3.bf16.msra.mxu1 (!%p173_p3), %v1176_v3  ;;  %1084 = vmatpush3.bf16.msra.mxu0 (!%p173_p3), %v1177_v4 }
   0xe   : > { %s1441_s16 = smov (!%p207_p4, %s947_s16), 31  ;;  %1053 = vmatprep.subr.bf16.mxu1 %v1178_v5  ;;  %1085 = vmatprep.subr.bf16.mxu0 %v1179_v6 }
   0xf   : > { %s948_s25 = sshll.u32 %s1441_s16, 3 }
  0x10   : > { %s1277_s28 = scalar_lea.vmem %s1432_s0, %s948_s25  ;;  %s1405_s6 = scalar_lea.vmem %s1435_s3, %s948_s25 }
  0x11   : > { %v234_v7 = vld [vmem:[%s1277_s28 + $0x10] sm:$0xff]  ;;  %v232_v8 = vld [vmem:[%s1277_s28] sm:$0xff]  ;;  %v233_v10 = vld [vmem:[%s1277_s28 + $0x8] sm:$0xff]  ;;  %1054 = vmatpush3.bf16.msra.mxu1 %v1178_v5  ;;  %1086 = vmatpush3.bf16.msra.mxu0 %v1179_v6 }
  0x12   : > { %338 = vperm.xlu0 %1158, %v234_v7   ;;  %332 = vperm.xlu1 %1156, %v232_v8   ;;  %v238_v9 = vld [vmem:[%s1277_s28 + $0x30] sm:$0xff]  ;;  %v235_v12 = vld [vmem:[%s1277_s28 + $0x18] sm:$0xff]  ;;  %v236_v22 = vld [vmem:[%s1277_s28 + $0x20] sm:$0xff] }
  0x13   : > { %v242_v11 = vld [vmem:[%s1277_s28 + $0x50] sm:$0xff]  ;;  %1055 = vmatprep.subr.bf16.mxu1 %v1180_v13  ;;  %1087 = vmatprep.subr.bf16.mxu0 %v1181_v14  ;;  %v237_v25 = vld [vmem:[%s1277_s28 + $0x28] sm:$0xff]  ;;  %v239_v27 = vld [vmem:[%s1277_s28 + $0x38] sm:$0xff] }
  0x14   : > { %v241_v26 = vld [vmem:[%s1277_s28 + $0x48] sm:$0xff]  ;;  %v240_v29 = vld [vmem:[%s1277_s28 + $0x40] sm:$0xff]  ;;  %v246_v30 = vld [vmem:[%s1277_s28 + $0x70] sm:$0xff] }
  0x15   : > { %1056 = vmatpush3.bf16.msra.mxu1 %v1180_v13  ;;  %1088 = vmatpush3.bf16.msra.mxu0 %v1181_v14  ;;  %v245_v28 = vld [vmem:[%s1277_s28 + $0x68] sm:$0xff]  ;;  %v243_v31 = vld [vmem:[%s1277_s28 + $0x58] sm:$0xff]  ;;  %v244_v32 = vld [vmem:[%s1277_s28 + $0x60] sm:$0xff] }
  0x16   : > { %350 = vperm.xlu0 %1158, %v238_v9   ;;  %335 = vperm.xlu1 %1156, %v233_v10   ;;  %v247_v33 = vld [vmem:[%s1277_s28 + $0x78] sm:$0xff] }
  0x17   : > { %1057 = vmatprep.subr.bf16.mxu1 %v1182_v15  ;;  %1089 = vmatprep.subr.bf16.mxu0 %v1183_v16 }
  0x19   : > { %1058 = vmatpush3.bf16.msra.mxu1 %v1182_v15  ;;  %1090 = vmatpush3.bf16.msra.mxu0 %v1183_v16 }
  0x1a   : > { %362 = vperm.xlu0 %1158, %v242_v11   ;;  %1157 = vset.pattern.permute.xlu1 %v1215_v17 }
  0x1b   : > { %277 = vperm.xlu1 %1157, %v235_v12   ;;  %1059 = vmatprep.subr.bf16.mxu1 %v1184_v18 }
  0x1c   : > { %1091 = vmatprep.subr.bf16.mxu0 %v1185_v19 }
  0x1d   : > { %1060 = vmatpush3.bf16.msra.mxu1 %v1184_v18  ;;  %1092 = vmatpush3.bf16.msra.mxu0 %v1185_v19 }
  0x1e   : > { %1167 = vset.pattern.permute.xlu0 %v1215_v17  ;;  %1061 = vmatprep.subr.bf16.mxu1 %v1186_v20 }
  0x1f   : > { %268 = vperm.xlu0 %1167, %v232_v8   ;;  %1159 = vset.pattern.permute.xlu1 %v1214_v1 }
  0x20   : > { %341 = vperm.xlu1 %1159, %v235_v12   ;;  %1093 = vmatprep.subr.bf16.mxu0 %v1187_v21 }
  0x21   : > { %1062 = vmatpush3.bf16.msra.mxu1 %v1186_v20  ;;  %1094 = vmatpush3.bf16.msra.mxu0 %v1187_v21 }
  0x22   : > { %1063 = vmatprep.subr.bf16.mxu1 %v1188_v23  ;;  %1095 = vmatprep.subr.bf16.mxu0 %v1189_v24 }
  0x23   : > { %271 = vperm.xlu0 %1167, %v233_v10  }
  0x24   : > { %1160 = vset.pattern.permute.xlu1 %v1215_v17 }
  0x25   : > { %280 = vperm.xlu1 %1160, %v236_v22   ;;  %1064 = vmatpush3.bf16.msra.mxu1 %v1188_v23 }
  0x26   : > { %1096 = vmatpush3.bf16.msra.mxu0 %v1189_v24 }
  0x27   : > { %274 = vperm.xlu0 %1167, %v234_v7  }
  0x29   : > { %1161 = vset.pattern.permute.xlu1 %v1214_v1 }
  0x2a   : > { %344 = vperm.xlu1 %1161, %v236_v22  }
  0x2b   : > { %283 = vperm.xlu0 %1167, %v237_v25  }
  0x2e   : > { %347 = vperm.xlu1 %1161, %v237_v25  }
  0x2f   : > { %286 = vperm.xlu0 %1167, %v238_v9  }
  0x32   : > { %1162 = vset.pattern.permute.xlu1 %v1215_v17 }
  0x33   : > { %295 = vperm.xlu0 %1167, %v241_v26   ;;  %289 = vperm.xlu1 %1162, %v239_v27  }
  0x37   : > { %298 = vperm.xlu0 %1167, %v242_v11   ;;  %1163 = vset.pattern.permute.xlu1 %v1214_v1 }
  0x38   : > { %353 = vperm.xlu1 %1163, %v239_v27  }
  0x3b   : > { %307 = vperm.xlu0 %1167, %v245_v28  }
  0x3c   : > { %1164 = vset.pattern.permute.xlu1 %v1215_v17 }
  0x3d   : > { %292 = vperm.xlu1 %1164, %v240_v29  }
  0x3f   : > { %310 = vperm.xlu0 %1167, %v246_v30  }
  0x41   : > { %1165 = vset.pattern.permute.xlu1 %v1214_v1 }
  0x42   : > { %356 = vperm.xlu1 %1165, %v240_v29  }
  0x43   : > { %1172 = vset.pattern.permute.xlu0 %v1214_v1 }
  0x44   : > { %374 = vperm.xlu0 %1172, %v246_v30  }
  0x46   : > { %359 = vperm.xlu1 %1165, %v241_v26  }
  0x4a   : > { %1166 = vset.pattern.permute.xlu1 %v1215_v17 }
  0x4b   : > { %301 = vperm.xlu1 %1166, %v243_v31  }
  0x4f   : > { %1168 = vset.pattern.permute.xlu1 %v1214_v1 }
  0x50   : > { %365 = vperm.xlu1 %1168, %v243_v31  }
  0x54   : > { %1169 = vset.pattern.permute.xlu1 %v1215_v17 }
  0x55   : > { %304 = vperm.xlu1 %1169, %v244_v32  }
  0x59   : > { %1170 = vset.pattern.permute.xlu1 %v1214_v1 }
  0x5a   : > { %368 = vperm.xlu1 %1170, %v244_v32  }
  0x5e   : > { %371 = vperm.xlu1 %1170, %v245_v28  }
  0x62   : > { %1171 = vset.pattern.permute.xlu1 %v1215_v17 }
  0x63   : > { %313 = vperm.xlu1 %1171, %v247_v33  }
  0x67   : > { %1173 = vset.pattern.permute.xlu1 %v1214_v1 }
  0x68   : > { %377 = vperm.xlu1 %1173, %v247_v33  }
  0x91   : > { %v333_v34 = vpop.permute.xlu1 %332  ;;  %v339_v35 = vpop.permute.xlu0 %338 }
  0x92   : > { %vm379_vm1 = vcmp.eq.s32.totalorder %v1349_v41, %v333_v34  ;;  %vm381_vm7 = vcmp.eq.s32.totalorder %v1349_v41, %v339_v35 }
  0x95   : > { %v336_v36 = vpop.permute.xlu1 %335  ;;  %v351_v37 = vpop.permute.xlu0 %350 }
  0x96   : > { %vm380_vm2 = vcmp.eq.s32.totalorder %v1349_v41, %v336_v36 }
  0x99   : > { %v1347_v38 = vpop.permute.xlu0 %362 }
  0x9a   : > { %v278_v40 = vpop.permute.xlu1 %277 }
  0x9b   : > { %vm318_vm9 = vcmp.eq.s32.totalorder %v1349_v41, %v278_v40 }
  0x9e   : > { %v269_v42 = vpop.permute.xlu0 %268 }
  0x9f   : > { %v342_v43 = vpop.permute.xlu1 %341  ;;  %vm315_vm0 = vcmp.eq.s32.totalorder %v1349_v41, %v269_v42 }
  0xa0   : > { %vm395_vm4 = vmor %vm315_vm0, %vm379_vm1  ;;  %vm382_vm5 = vcmp.eq.s32.totalorder %v1349_v41, %v342_v43 }
  0xa1   : > { %vm398_vm10 = vmor %vm318_vm9, %vm382_vm5  ;;  %vm385_vm5 = vcmp.eq.s32.totalorder %v1349_v41, %v351_v37 }
  0xa2   : > { %v272_v44 = vpop.permute.xlu0 %271 }
  0xa3   : > { %vm316_vm3 = vcmp.eq.s32.totalorder %v1349_v41, %v272_v44 }
  0xa4   : > { %v281_v45 = vpop.permute.xlu1 %280  ;;  %vm396_vm6 = vmor %vm316_vm3, %vm380_vm2 }
  0xa5   : > { %vm975_vm8 = vmpackc.low %vm396_vm6, %vm395_vm4  ;;  %vm319_vm0 = vcmp.eq.s32.totalorder %v1349_v41, %v281_v45 }
  0xa6   : > { %v275_v46 = vpop.permute.xlu0 %274  ;;  %1065 = vmatprep.mubr.msk.bf16.mxu1 %vm975_vm8, %v1216_v47  ;;  %1097 = vmatprep.mubr.msk.bf16.mxu0 %vm975_vm8, %v1216_v47 }
  0xa7   : > { %vm317_vm11 = vcmp.eq.s32.totalorder %v1349_v41, %v275_v46 }
  0xa8   : > { %vm397_vm12 = vmor %vm317_vm11, %vm381_vm7 }
  0xa9   : > { %vm977_vm13 = vmpackc.low %vm398_vm10, %vm397_vm12  ;;  %v345_v48 = vpop.permute.xlu1 %344 }
  0xaa   : > { %1066 = vmatmul.mubr.msk.bf16.vlgmr.msra.gmra.mrb[0].mxu1 %vm977_vm13, %v1216_v47  ;;  %1098 = vmatmul.mubr.msk.bf16.vlgmr.msra.gmra.mrb[0].mxu0 %vm977_vm13, %v1216_v47  ;;  %vm383_vm14 = vcmp.eq.s32.totalorder %v1349_v41, %v345_v48  ;;  %v284_v49 = vpop.permute.xlu0 %283 }
  0xab   : > { %vm320_vm15 = vcmp.eq.s32.totalorder %v1349_v41, %v284_v49  ;;  %vm399_vm1 = vmor %vm319_vm0, %vm383_vm14 }
  0xad   : > { %v348_v50 = vpop.permute.xlu1 %347 }
  0xae   : > { %vm384_vm2 = vcmp.eq.s32.totalorder %v1349_v41, %v348_v50  ;;  %v287_v52 = vpop.permute.xlu0 %286 }
  0xaf   : > { %vm400_vm3 = vmor %vm320_vm15, %vm384_vm2  ;;  %vm321_vm6 = vcmp.eq.s32.totalorder %v1349_v41, %v287_v52 }
  0xb0   : > { %vm979_vm4 = vmpackc.low %vm400_vm3, %vm399_vm1  ;;  %vm389_vm3 = vcmp.eq.s32.totalorder %v1349_v41, %v1347_v38 }
  0xb1   : > { %1069 = vmatprep.mubr.msk.bf16.mxu1 %vm979_vm4, %v1216_v47  ;;  %1101 = vmatprep.mubr.msk.bf16.mxu0 %vm979_vm4, %v1216_v47  ;;  %vm401_vm7 = vmor %vm321_vm6, %vm385_vm5 }
  0xb2   : > { %v290_v51 = vpop.permute.xlu1 %289  ;;  %v296_v56 = vpop.permute.xlu0 %295 }
  0xb3   : > { %vm322_vm8 = vcmp.eq.s32.totalorder %v1349_v41, %v290_v51  ;;  %vm324_vm14 = vcmp.eq.s32.totalorder %v1349_v41, %v296_v56 }
  0xb6   : > { %v299_v58 = vpop.permute.xlu0 %298 }
  0xb7   : > { %v354_v53 = vpop.permute.xlu1 %353  ;;  %vm325_vm4 = vcmp.eq.s32.totalorder %v1349_v41, %v299_v58 }
  0xb8   : > { %vm386_vm9 = vcmp.eq.s32.totalorder %v1349_v41, %v354_v53  ;;  %vm405_vm5 = vmor %vm325_vm4, %vm389_vm3 }
  0xb9   : > { %vm402_vm10 = vmor %vm322_vm8, %vm386_vm9 }
  0xba   : > { %vm981_vm11 = vmpackc.low %vm402_vm10, %vm401_vm7  ;;  %v308_v62 = vpop.permute.xlu0 %307 }
  0xbb   : > { %1070 = vmatmul.mubr.msk.bf16.gmra.mrb[4].mxu1 %vm981_vm11, %v1216_v47  ;;  %1102 = vmatmul.mubr.msk.bf16.gmra.mrb[4].mxu0 %vm981_vm11, %v1216_v47 }
  0xbc   : > { %v293_v54 = vpop.permute.xlu1 %292 }
  0xbd   : > { %vm323_vm13 = vcmp.eq.s32.totalorder %v1349_v41, %v293_v54 }
  0xbe   : > { %v311_v0 = vpop.permute.xlu0 %310 }
  0xc1   : > { %v357_v55 = vpop.permute.xlu1 %356 }
  0xc2   : > { %vm387_vm12 = vcmp.eq.s32.totalorder %v1349_v41, %v357_v55 }
  0xc3   : > { %vm403_vm15 = vmor %vm323_vm13, %vm387_vm12  ;;  %vm328_vm12 = vcmp.eq.s32.totalorder %v1349_v41, %v308_v62  ;;  %v375_v2 = vpop.permute.xlu0 %374 }
  0xc5   : > { %v360_v57 = vpop.permute.xlu1 %359 }
  0xc6   : > { %vm388_vm0 = vcmp.eq.s32.totalorder %v1349_v41, %v360_v57 }
  0xc7   : > { %vm404_vm1 = vmor %vm324_vm14, %vm388_vm0 }
  0xc8   : > { %vm983_vm2 = vmpackc.low %vm404_vm1, %vm403_vm15  ;;  %vm329_vm1 = vcmp.eq.s32.totalorder %v1349_v41, %v311_v0 }
  0xc9   : > { %1073 = vmatprep.mubr.msk.bf16.mxu1 %vm983_vm2, %v1216_v47  ;;  %1105 = vmatprep.mubr.msk.bf16.mxu0 %vm983_vm2, %v1216_v47  ;;  %vm393_vm2 = vcmp.eq.s32.totalorder %v1349_v41, %v375_v2 }
  0xca   : > { %v302_v59 = vpop.permute.xlu1 %301  ;;  %vm409_vm3 = vmor %vm329_vm1, %vm393_vm2 }
  0xcb   : > { %vm326_vm6 = vcmp.eq.s32.totalorder %v1349_v41, %v302_v59 }
  0xcf   : > { %v366_v60 = vpop.permute.xlu1 %365 }
  0xd0   : > { %vm390_vm7 = vcmp.eq.s32.totalorder %v1349_v41, %v366_v60 }
  0xd1   : > { %vm406_vm8 = vmor %vm326_vm6, %vm390_vm7 }
  0xd2   : > { %vm985_vm9 = vmpackc.low %vm406_vm8, %vm405_vm5 }
  0xd3   : > { %1074 = vmatmul.mubr.msk.bf16.gmra.mrb[8].mxu1 %vm985_vm9, %v1216_v47  ;;  %1106 = vmatmul.mubr.msk.bf16.gmra.mrb[8].mxu0 %vm985_vm9, %v1216_v47 }
  0xd4   : > { %v305_v61 = vpop.permute.xlu1 %304 }
  0xd5   : > { %vm327_vm11 = vcmp.eq.s32.totalorder %v1349_v41, %v305_v61 }
  0xd9   : > { %v369_v63 = vpop.permute.xlu1 %368 }
  0xda   : > { %vm391_vm10 = vcmp.eq.s32.totalorder %v1349_v41, %v369_v63 }
  0xdb   : > { %vm407_vm13 = vmor %vm327_vm11, %vm391_vm10 }
  0xdd   : > { %v372_v1 = vpop.permute.xlu1 %371 }
  0xde   : > { %vm392_vm14 = vcmp.eq.s32.totalorder %v1349_v41, %v372_v1 }
  0xdf   : > { %vm408_vm15 = vmor %vm328_vm12, %vm392_vm14 }
  0xe0   : > { %vm987_vm0 = vmpackc.low %vm408_vm15, %vm407_vm13 }
  0xe1   : > { %1077 = vmatprep.mubr.msk.bf16.mxu1 %vm987_vm0, %v1216_v47  ;;  %1109 = vmatprep.mubr.msk.bf16.mxu0 %vm987_vm0, %v1216_v47 }
  0xe2   : > { %v314_v3 = vpop.permute.xlu1 %313 }
  0xe3   : > { %vm330_vm4 = vcmp.eq.s32.totalorder %v1349_v41, %v314_v3 }
  0xe7   : > { %v378_v4 = vpop.permute.xlu1 %377 }
  0xe8   : > { %vm394_vm5 = vcmp.eq.s32.totalorder %v1349_v41, %v378_v4 }
  0xe9   : > { %vm410_vm6 = vmor %vm330_vm4, %vm394_vm5 }
  0xea   : > { %vm989_vm7 = vmpackc.low %vm410_vm6, %vm409_vm3 }
  0xeb   : > { %1078 = vmatmul.mubr.msk.bf16.gmra.mrb[12].mxu1 %vm989_vm7, %v1216_v47  ;;  %1110 = vmatmul.mubr.msk.bf16.gmra.mrb[12].mxu0 %vm989_vm7, %v1216_v47 }
 0x17d   : > { %v1067_v5 = vpop.f32.mrb[0].mxu1  ;;  %v1099_v6 = vpop.f32.mrb[0].mxu0 }
 0x17e   : > { %v719_v7 = vadd.f32 %v1099_v6, %v1067_v5  ;;  %v565_v8 = vpop.f32.mrb[1].mxu1  ;;  %v710_v9 = vpop.f32.mrb[1].mxu0 }
 0x17f   : > { %v711_v10 = vadd.f32 %v710_v9, %v565_v8  ;;  %v1068_v11 = vpop.f32.mrb[2].mxu1  ;;  %v1100_v12 = vpop.f32.mrb[2].mxu0 }
 0x180   : > { %779 = vst [vmem:[%s1405_s6 + $0x10] sm:$0xff] %v719_v7  ;;  %v722_v13 = vadd.f32 %v1100_v12, %v1068_v11  ;;  %v568_v14 = vpop.f32.mrb[3].mxu1  ;;  %v713_v15 = vpop.f32.mrb[3].mxu0 }
 0x181   : > { %777 = vst [vmem:[%s1405_s6] sm:$0xff] %v711_v10  ;;  %v714_v16 = vadd.f32 %v713_v15, %v568_v14 }
 0x182   : > { %780 = vst [vmem:[%s1405_s6 + $0x18] sm:$0xff] %v722_v13 }
 0x183   : > { %778 = vst [vmem:[%s1405_s6 + $0x8] sm:$0xff] %v714_v16 }
 0x18e   : > { %v1071_v17 = vpop.f32.mrb[4].mxu1  ;;  %v1103_v18 = vpop.f32.mrb[4].mxu0 }
 0x18f   : > { %v735_v19 = vadd.f32 %v1103_v18, %v1071_v17  ;;  %v581_v20 = vpop.f32.mrb[5].mxu1  ;;  %v726_v21 = vpop.f32.mrb[5].mxu0 }
 0x190   : > { %v727_v22 = vadd.f32 %v726_v21, %v581_v20  ;;  %v1072_v23 = vpop.f32.mrb[6].mxu1  ;;  %v1104_v24 = vpop.f32.mrb[6].mxu0 }
 0x191   : > { %783 = vst [vmem:[%s1405_s6 + $0x30] sm:$0xff] %v735_v19  ;;  %v738_v25 = vadd.f32 %v1104_v24, %v1072_v23  ;;  %v584_v26 = vpop.f32.mrb[7].mxu1  ;;  %v729_v27 = vpop.f32.mrb[7].mxu0 }
 0x192   : > { %781 = vst [vmem:[%s1405_s6 + $0x20] sm:$0xff] %v727_v22  ;;  %v730_v28 = vadd.f32 %v729_v27, %v584_v26 }
 0x193   : > { %784 = vst [vmem:[%s1405_s6 + $0x38] sm:$0xff] %v738_v25 }
 0x194   : > { %782 = vst [vmem:[%s1405_s6 + $0x28] sm:$0xff] %v730_v28 }
 0x1a6   : > { %v1075_v29 = vpop.f32.mrb[8].mxu1  ;;  %v1107_v30 = vpop.f32.mrb[8].mxu0 }
 0x1a7   : > { %v751_v31 = vadd.f32 %v1107_v30, %v1075_v29  ;;  %v597_v32 = vpop.f32.mrb[9].mxu1  ;;  %v742_v33 = vpop.f32.mrb[9].mxu0 }
 0x1a8   : > { %v743_v34 = vadd.f32 %v742_v33, %v597_v32  ;;  %v1076_v35 = vpop.f32.mrb[10].mxu1  ;;  %v1108_v36 = vpop.f32.mrb[10].mxu0 }
 0x1a9   : > { %787 = vst [vmem:[%s1405_s6 + $0x50] sm:$0xff] %v751_v31  ;;  %v754_v37 = vadd.f32 %v1108_v36, %v1076_v35  ;;  %v600_v38 = vpop.f32.mrb[11].mxu1  ;;  %v745_v39 = vpop.f32.mrb[11].mxu0 }
 0x1aa   : > { %785 = vst [vmem:[%s1405_s6 + $0x40] sm:$0xff] %v743_v34  ;;  %v746_v40 = vadd.f32 %v745_v39, %v600_v38 }
 0x1ab   : > { %788 = vst [vmem:[%s1405_s6 + $0x58] sm:$0xff] %v754_v37 }
 0x1ac   : > { %786 = vst [vmem:[%s1405_s6 + $0x48] sm:$0xff] %v746_v40 }
 0x1be   : > { %v1079_v41 = vpop.f32.mrb[12].mxu1  ;;  %v1111_v42 = vpop.f32.mrb[12].mxu0 }
 0x1bf   : > { %v767_v43 = vadd.f32 %v1111_v42, %v1079_v41  ;;  %v613_v44 = vpop.f32.mrb[13].mxu1  ;;  %v758_v45 = vpop.f32.mrb[13].mxu0 }
 0x1c0   : > { %v759_v46 = vadd.f32 %v758_v45, %v613_v44  ;;  %v1080_v47 = vpop.f32.mrb[14].mxu1  ;;  %v1112_v48 = vpop.f32.mrb[14].mxu0 }
 0x1c1   : > { %791 = vst [vmem:[%s1405_s6 + $0x70] sm:$0xff] %v767_v43  ;;  %v770_v49 = vadd.f32 %v1112_v48, %v1080_v47  ;;  %v616_v50 = vpop.f32.mrb[15].mxu1  ;;  %v761_v51 = vpop.f32.mrb[15].mxu0 }
 0x1c2   : > { %789 = vst [vmem:[%s1405_s6 + $0x60] sm:$0xff] %v759_v46  ;;  %v762_v52 = vadd.f32 %v761_v51, %v616_v50 }
 0x1c3   : > { %792 = vst [vmem:[%s1405_s6 + $0x78] sm:$0xff] %v770_v49 }
 0x1c4   : > { %790 = vst [vmem:[%s1405_s6 + $0x68] sm:$0xff] %v762_v52 }
 0x1c5 PF: > { %s13_s14 = sadd.s32 1, %s1212_s14   ;;  %s1436_s12 = smov %s1208_s13 }
 0x1c6   : > { %p10_p5 = scmp.ge.s32.totalorder %s13_s14, 4   ;;  %s1437_s13 = smov %s1439_s15 }
 0x1c8   :  { %12 = sbr.rel (!%p10_p5) target bundleno = 2 (0x2), region = 76 }

</bundles_post_ra>
